<compile_context>
chip_gen: v6e
topology: v6e:2x2x1
jax: 0.10.0
libtpu: 0.0.40
codegen_flags: <defaults>
</compile_context>

<pallas_src>
import functools
import math

import jax
import jax.numpy as jnp
from jax.experimental import pallas as pl
from jax.experimental.pallas import tpu as pltpu


def _pick_tile(dim: int, pref: int = 512) -> int:
    """Largest 128-multiple tile (<= pref) that divides dim, else the full dim."""
    if dim % 128 == 0:
        for t in (pref, 256, 128):
            if t <= dim and dim % t == 0:
                return t
    return dim


def _c1d_kernel(x_ref, w_ref, scale_ref, shift_ref, o_ref, acc_ref, *, K, L):
    # x_ref:     (1, L_pad, TD)   padded input slice (channels-last)
    # w_ref:     (K, TD, TF)      conv weight, tap-major
    # scale_ref: (L, 1)           fused BN scale  (gamma / sqrt(var + eps))
    # shift_ref: (L, 1)           fused BN shift  (beta - mean * scale)
    # o_ref:     (1, L, TF)
    # acc_ref:   (L, TF) f32 accumulator, resident across the D-tile axis
    di = pl.program_id(2)

    @pl.when(di == 0)
    def _():
        acc_ref[...] = jnp.zeros_like(acc_ref)

    # Conv1d as K shifted matmuls on the MXU (static unroll, K is tiny).
    s = jnp.dot(x_ref[0, 0:L, :], w_ref[0], preferred_element_type=jnp.float32)
    for k in range(1, K):
        s += jnp.dot(x_ref[0, k:k + L, :], w_ref[k],
                     preferred_element_type=jnp.float32)
    acc_ref[...] += s

    @pl.when(di == pl.num_programs(2) - 1)
    def _():
        y = acc_ref[...] * scale_ref[...] + shift_ref[...]   # BatchNorm (per-L channel)
        y = jnp.where(y >= 0.0, y, 0.2 * y)                  # LeakyReLU(0.2)
        o_ref[0] = y.astype(o_ref.dtype)


def c1d_forward(x, weight, gamma, beta, running_mean, running_var,
                *, kernel: int, eps: float = 1e-5):
    """Pallas equivalent of c1D.forward (inference-mode BatchNorm)."""
    N, L, D = x.shape
    F_out, D_w, K = weight.shape
    assert D_w == D and K == kernel

    pad_left = math.ceil((K - 1) / 2)          # PyTorch module's padding
    pad_right = K - 1 - pad_left               # covers the cut_last_element case
    L_pad = L + K - 1

    # Channels-last padded input: the permutes are fused away.
    x_pad = jnp.pad(x, ((0, 0), (pad_left, pad_right), (0, 0)))
    # Torch weight (F, D, K) -> tap-major (K, D, F) so each tap is a (D, F) matmul.
    w_kdf = jnp.transpose(weight, (2, 1, 0)).astype(x.dtype)

    # Fold BatchNorm into a per-L-channel scale/shift.
    inv_std = 1.0 / jnp.sqrt(running_var.astype(jnp.float32) + eps)
    scale = (gamma.astype(jnp.float32) * inv_std).reshape(L, 1)
    shift = (beta.astype(jnp.float32)
             - running_mean.astype(jnp.float32) * gamma.astype(jnp.float32) * inv_std
             ).reshape(L, 1)

    TD = _pick_tile(D)
    TF = _pick_tile(F_out)
    grid = (N, F_out // TF, D // TD)

    kernel_fn = functools.partial(_c1d_kernel, K=K, L=L)

    itemsize = jnp.dtype(x.dtype).itemsize
    cost = pl.CostEstimate(
        flops=2 * N * L * F_out * D * K,
        transcendentals=0,
        bytes_accessed=(x_pad.size + w_kdf.size + N * L * F_out) * itemsize
                       + 2 * L * 4,
    )

    return pl.pallas_call(
        kernel_fn,
        out_shape=jax.ShapeDtypeStruct((N, L, F_out), x.dtype),
        grid_spec=pltpu.PrefetchScalarGridSpec(
            num_scalar_prefetch=0,
            grid=grid,
            in_specs=[
                pl.BlockSpec((1, L_pad, TD), lambda n, fi, di: (n, 0, di)),
                pl.BlockSpec((K, TD, TF), lambda n, fi, di: (0, di, fi)),
                pl.BlockSpec((L, 1), lambda n, fi, di: (0, 0)),
                pl.BlockSpec((L, 1), lambda n, fi, di: (0, 0)),
            ],
            out_specs=pl.BlockSpec((1, L, TF), lambda n, fi, di: (n, 0, fi)),
            scratch_shapes=[pltpu.VMEM((L, TF), jnp.float32)],
        ),
        compiler_params=pltpu.CompilerParams(
            dimension_semantics=("parallel", "parallel", "arbitrary"),
        ),
        cost_estimate=cost,
    )(x_pad, w_kdf, scale, shift)


def _reference(x, weight, gamma, beta, running_mean, running_var,
               *, kernel: int, eps: float = 1e-5):
    """Pure-JAX replica of the PyTorch graph (eval-mode BN)."""
    pad = math.ceil((kernel - 1) / 2)
    xp = jnp.transpose(x, (0, 2, 1))                     # (N, D, L)
    out = jax.lax.conv_general_dilated(
        xp, weight, window_strides=(1,), padding=[(pad, pad)],
        dimension_numbers=("NCH", "OIH", "NCH"))          # (N, F, L_out)
    if kernel % 2 == 0:
        out = out[:, :, :-1]
    out = jnp.transpose(out, (0, 2, 1))                   # (N, L, F)
    out = (out - running_mean[None, :, None]) / jnp.sqrt(running_var[None, :, None] + eps)
    out = out * gamma[None, :, None] + beta[None, :, None]
    return jnp.where(out >= 0.0, out, 0.2 * out)


if __name__ == "__main__":
    key = jax.random.PRNGKey(0)
    # Small shapes consistent with c1D: batch=2, input_channels(L)=8,
    # input_dims(D)=32, filters(F)=16.
    N, L, D, F_out = 2, 8, 32, 16

    all_ok = True
    for K in (3, 2):  # odd kernel, and even kernel (cut_last_element branch)
        key, k1, k2, k3, k4, k5, k6 = jax.random.split(key, 7)
        x = jax.random.normal(k1, (N, L, D), dtype=jnp.float32)
        w = jax.random.normal(k2, (F_out, D, K), dtype=jnp.float32) * 0.1
        gamma = 1.0 + 0.1 * jax.random.normal(k3, (L,), dtype=jnp.float32)
        beta = 0.1 * jax.random.normal(k4, (L,), dtype=jnp.float32)
        mean = 0.1 * jax.random.normal(k5, (L,), dtype=jnp.float32)
        var = jax.nn.softplus(jax.random.normal(k6, (L,), dtype=jnp.float32)) + 0.5

        out = c1d_forward(x, w, gamma, beta, mean, var, kernel=K)
        jax.block_until_ready(out)

        ref = _reference(x, w, gamma, beta, mean, var, kernel=K)
        assert out.shape == ref.shape == (N, L, F_out)
        assert out.dtype == x.dtype
        err = float(jnp.max(jnp.abs(out - ref)))
        all_ok = all_ok and (err < 1e-4)

    if all_ok:
        print("KERNEL_OK")
</pallas_src>

<mosaic_0001>
module attributes {stable_mosaic.version = 11 : i64} {
  func.func @_c1d_kernel(%arg0: i32, %arg1: i32, %arg2: i32, %arg3: memref<1x10x32xf32, #tpu.memory_space<vmem>>, %arg4: memref<3x32x16xf32, #tpu.memory_space<vmem>>, %arg5: memref<8x1xf32, #tpu.memory_space<vmem>>, %arg6: memref<8x1xf32, #tpu.memory_space<vmem>>, %arg7: memref<1x8x16xf32, #tpu.memory_space<vmem>>, %arg8: memref<8x16xf32, #tpu.memory_space<vmem>>) attributes {dimension_semantics = [#tpu.dimension_semantics<parallel>, #tpu.dimension_semantics<parallel>, #tpu.dimension_semantics<arbitrary>], iteration_bounds = array<i64: 2, 1, 1>, scalar_prefetch = 0 : i64, scratch_operands = 1 : i64, tpu.core_type = #tpu.core_type<tc>, window_params = [{transform_indices = @transform_0, window_bounds = array<i64: 1, 10, 32>}, {transform_indices = @transform_1, window_bounds = array<i64: 3, 32, 16>}, {pipeline_mode = #tpu.pipeline_mode<synchronous>, transform_indices = @transform_2, window_bounds = array<i64: 8, 1>}, {pipeline_mode = #tpu.pipeline_mode<synchronous>, transform_indices = @transform_3, window_bounds = array<i64: 8, 1>}, {transform_indices = @transform_4, window_bounds = array<i64: 1, 8, 16>}]} {
    %c0_i32 = arith.constant 0 : i32
    %0 = arith.cmpi eq, %arg2, %c0_i32 : i32
    %1 = arith.extui %0 : i1 to i32
    %c0_i32_0 = arith.constant 0 : i32
    %2 = arith.cmpi ne, %1, %c0_i32_0 : i32
    scf.if %2 {
      %cst_24 = arith.constant 0.000000e+00 : f32
      %26 = vector.broadcast %cst_24 : f32 to vector<8x16xf32>
      %c0_25 = arith.constant 0 : index
      %c0_26 = arith.constant 0 : index
      %27 = vector.load %arg8[%c0_25, %c0_26] : memref<8x16xf32, #tpu.memory_space<vmem>>, vector<8x16xf32>
      tpu.vector_store %arg8[%c0_25, %c0_26], %26 {strides = array<i32>} : memref<8x16xf32, #tpu.memory_space<vmem>>, vector<8x16xf32>,
    } else {
    }
    %c0 = arith.constant 0 : index
    %c0_1 = arith.constant 0 : index
    %c0_2 = arith.constant 0 : index
    %3 = vector.load %arg3[%c0, %c0_1, %c0_2] : memref<1x10x32xf32, #tpu.memory_space<vmem>>, vector<1x8x32xf32>
    %4 = vector.shape_cast %3 : vector<1x8x32xf32> to vector<8x32xf32>
    %c0_3 = arith.constant 0 : index
    %c0_4 = arith.constant 0 : index
    %c0_5 = arith.constant 0 : index
    %5 = vector.load %arg4[%c0_3, %c0_4, %c0_5] : memref<3x32x16xf32, #tpu.memory_space<vmem>>, vector<1x32x16xf32>
    %6 = vector.shape_cast %5 : vector<1x32x16xf32> to vector<32x16xf32>
    %cst = arith.constant dense<0.000000e+00> : vector<8x16xf32>
    %7 = tpu.matmul %4, %6, %cst {dimension_numbers = #tpu.dot_dimension_numbers<[1], [0], [0], [1], [0, 0, 1, 1], [], []>} : vector<8x32xf32>, vector<32x16xf32>, vector<8x16xf32> -> vector<8x16xf32>
    %c0_6 = arith.constant 0 : index
    %c1 = arith.constant 1 : index
    %c0_7 = arith.constant 0 : index
    %8 = vector.load %arg3[%c0_6, %c1, %c0_7] : memref<1x10x32xf32, #tpu.memory_space<vmem>>, vector<1x8x32xf32>
    %9 = vector.shape_cast %8 : vector<1x8x32xf32> to vector<8x32xf32>
    %c1_8 = arith.constant 1 : index
    %c0_9 = arith.constant 0 : index
    %c0_10 = arith.constant 0 : index
    %10 = vector.load %arg4[%c1_8, %c0_9, %c0_10] : memref<3x32x16xf32, #tpu.memory_space<vmem>>, vector<1x32x16xf32>
    %11 = vector.shape_cast %10 : vector<1x32x16xf32> to vector<32x16xf32>
    %cst_11 = arith.constant dense<0.000000e+00> : vector<8x16xf32>
    %12 = tpu.matmul %9, %11, %cst_11 {dimension_numbers = #tpu.dot_dimension_numbers<[1], [0], [0], [1], [0, 0, 1, 1], [], []>} : vector<8x32xf32>, vector<32x16xf32>, vector<8x16xf32> -> vector<8x16xf32>
    %13 = arith.addf %7, %12 : vector<8x16xf32>
    %c0_12 = arith.constant 0 : index
    %c2 = arith.constant 2 : index
    %c0_13 = arith.constant 0 : index
    %14 = vector.load %arg3[%c0_12, %c2, %c0_13] : memref<1x10x32xf32, #tpu.memory_space<vmem>>, vector<1x8x32xf32>
    %15 = vector.shape_cast %14 : vector<1x8x32xf32> to vector<8x32xf32>
    %c2_14 = arith.constant 2 : index
    %c0_15 = arith.constant 0 : index
    %c0_16 = arith.constant 0 : index
    %16 = vector.load %arg4[%c2_14, %c0_15, %c0_16] : memref<3x32x16xf32, #tpu.memory_space<vmem>>, vector<1x32x16xf32>
    %17 = vector.shape_cast %16 : vector<1x32x16xf32> to vector<32x16xf32>
    %cst_17 = arith.constant dense<0.000000e+00> : vector<8x16xf32>
    %18 = tpu.matmul %15, %17, %cst_17 {dimension_numbers = #tpu.dot_dimension_numbers<[1], [0], [0], [1], [0, 0, 1, 1], [], []>} : vector<8x32xf32>, vector<32x16xf32>, vector<8x16xf32> -> vector<8x16xf32>
    %19 = arith.addf %13, %18 : vector<8x16xf32>
    %c0_18 = arith.constant 0 : index
    %c0_19 = arith.constant 0 : index
    %20 = vector.load %arg8[%c0_18, %c0_19] : memref<8x16xf32, #tpu.memory_space<vmem>>, vector<8x16xf32>
    %21 = arith.addf %20, %19 : vector<8x16xf32>
    %c0_20 = arith.constant 0 : index
    %c0_21 = arith.constant 0 : index
    %22 = vector.load %arg8[%c0_20, %c0_21] : memref<8x16xf32, #tpu.memory_space<vmem>>, vector<8x16xf32>
    tpu.vector_store %arg8[%c0_20, %c0_21], %21 {strides = array<i32>} : memref<8x16xf32, #tpu.memory_space<vmem>>, vector<8x16xf32>,
    %c0_i32_22 = arith.constant 0 : i32
    %23 = arith.cmpi eq, %arg2, %c0_i32_22 : i32
    %24 = arith.extui %23 : i1 to i32
    %c0_i32_23 = arith.constant 0 : i32
    %25 = arith.cmpi ne, %24, %c0_i32_23 : i32
    scf.if %25 {
      %c0_24 = arith.constant 0 : index
      %c0_25 = arith.constant 0 : index
      %26 = vector.load %arg8[%c0_24, %c0_25] : memref<8x16xf32, #tpu.memory_space<vmem>>, vector<8x16xf32>
      %c0_26 = arith.constant 0 : index
      %c0_27 = arith.constant 0 : index
      %27 = vector.load %arg5[%c0_26, %c0_27] : memref<8x1xf32, #tpu.memory_space<vmem>>, vector<8x1xf32>
      %28 = vector.broadcast %27 : vector<8x1xf32> to vector<8x16xf32>
      %29 = arith.mulf %26, %28 : vector<8x16xf32>
      %c0_28 = arith.constant 0 : index
      %c0_29 = arith.constant 0 : index
      %30 = vector.load %arg6[%c0_28, %c0_29] : memref<8x1xf32, #tpu.memory_space<vmem>>, vector<8x1xf32>
      %31 = vector.broadcast %30 : vector<8x1xf32> to vector<8x16xf32>
      %32 = arith.addf %29, %31 : vector<8x16xf32>
      %cst_30 = arith.constant 0.000000e+00 : f32
      %33 = vector.broadcast %cst_30 : f32 to vector<8x16xf32>
      %34 = arith.cmpf oge, %32, %33 : vector<8x16xf32>
      %cst_31 = arith.constant 2.000000e-01 : f32
      %35 = vector.broadcast %cst_31 : f32 to vector<8x16xf32>
      %36 = arith.mulf %35, %32 : vector<8x16xf32>
      %37 = arith.select %34, %32, %36 : vector<8x16xi1>, vector<8x16xf32>
      %c0_32 = arith.constant 0 : index
      %c0_33 = arith.constant 0 : index
      %c0_34 = arith.constant 0 : index
      %38 = vector.load %arg7[%c0_32, %c0_33, %c0_34] : memref<1x8x16xf32, #tpu.memory_space<vmem>>, vector<1x8x16xf32>
      %39 = vector.shape_cast %38 : vector<1x8x16xf32> to vector<8x16xf32>
      %40 = vector.shape_cast %37 : vector<8x16xf32> to vector<1x8x16xf32>
      tpu.vector_store %arg7[%c0_32, %c0_33, %c0_34], %40 {strides = array<i32>} : memref<1x8x16xf32, #tpu.memory_space<vmem>>, vector<1x8x16xf32>,
    } else {
    }
    return
  }
  func.func @transform_0(%arg0: i32, %arg1: i32, %arg2: i32) -> (i32, i32, i32) {
    %c0_i32 = arith.constant 0 : i32
    %c0_i32_0 = arith.constant 0 : i32
    return %arg0, %c0_i32, %arg2 : i32, i32, i32
  }
  func.func @transform_1(%arg0: i32, %arg1: i32, %arg2: i32) -> (i32, i32, i32) {
    %c0_i32 = arith.constant 0 : i32
    %c0_i32_0 = arith.constant 0 : i32
    return %c0_i32, %arg2, %arg1 : i32, i32, i32
  }
  func.func @transform_2(%arg0: i32, %arg1: i32, %arg2: i32) -> (i32, i32) {
    %c0_i32 = arith.constant 0 : i32
    %c0_i32_0 = arith.constant 0 : i32
    %c0_i32_1 = arith.constant 0 : i32
    return %c0_i32, %c0_i32_0 : i32, i32
  }
  func.func @transform_3(%arg0: i32, %arg1: i32, %arg2: i32) -> (i32, i32) {
    %c0_i32 = arith.constant 0 : i32
    %c0_i32_0 = arith.constant 0 : i32
    %c0_i32_1 = arith.constant 0 : i32
    return %c0_i32, %c0_i32_0 : i32, i32
  }
  func.func @transform_4(%arg0: i32, %arg1: i32, %arg2: i32) -> (i32, i32, i32) {
    %c0_i32 = arith.constant 0 : i32
    %c0_i32_0 = arith.constant 0 : i32
    return %arg0, %c0_i32, %arg1 : i32, i32, i32
  }
}

</mosaic_0001>

<bundles_post_ra>
// kernel: tpu_custom_call.1
= control target key start
LH: loop header
LB: loop body
LE: loop exit
PB: predicated region body
PF: predicated region fallthrough
CT: control target
= control target key end

     0   :  { %9 = vsyncpa [#allocation4], 0  ;;  %s1041_s0 = inlined_call_operand.vmem [shape: f32[2,10,32], index: 0, kind: input, shape index: {}]   ;;  %s1042_s1 = inlined_call_operand.vmem [shape: f32[3,32,16], index: 1, kind: input, shape index: {}]   ;;  %s1043_s2 = inlined_call_operand.vmem [shape: f32[8,1], index: 2, kind: input, shape index: {}]   ;;  %s1044_s3 = inlined_call_operand.vmem [shape: f32[8,1], index: 3, kind: input, shape index: {}]   ;;  %s1045_s4 = inlined_call_operand.hbm [shape: f32[2,8,16], index: 4, kind: output, shape index: {}]  }
   0x1   :  { %11 = vsyncpa [#allocation4 + $0x1], 0  ;;  %s880_s15 = smov 0   ;;  %s882_s16 = smov 0  }
   0x2   :  { %s884_s17 = smov 0   ;;  %s886_s18 = smov 0  }
   0x3   :  { %s888_s19 = smov 0   ;;  %s890_s20 = smov 0  }
   0x4 LB: > { %s641_s21 = sadd.s32 4294967295, %s849_s20   ;;  %s642_s22 = sadd.s32 4294967294, %s849_s20   ;;  %s849_s20 = sphi %s890_s20, %s17_s20   ;;  %s845_s19 = sphi %s888_s19, %s1052_s19   ;;  %s841_s18 = sphi %s886_s18, %s1051_s18   ;;  %s837_s17 = sphi %s884_s17, %s1050_s17   ;;  %s833_s16 = sphi %s882_s16, %s1049_s16   ;;  %s829_s15 = sphi %s880_s15, %s1048_s15  }
   0x5   : > { %s36_s23 = sadd.s32 1, %s845_s19  ;;  %s143_s24 = sadd.s32 1, %s837_s17 }
   0x6   : > { %p38_p0 = scmp.ge.s32.totalorder %s36_s23, 2  ;;  %p153_p1 = scmp.ne.s32.totalorder %s837_s17, %s833_s16 }
   0x7   : > { %p154_p2 = scmp.eq.s32.totalorder %s641_s21, 1  ;;  %p159_p3 = scmp.ne.s32.totalorder %s833_s16, %s829_s15 }
   0x8   : > { %s1054_s23 = smov (%p38_p0, %s36_s23), 0  ;;  %p160_p5 = scmp.eq.s32.totalorder %s642_s22, 1 }
   0x9   : > { %p920_p4 = por %p154_p2, %p153_p1  ;;  %s138_s26 = ssub.s32 %s845_s19, %s1054_s23 }
   0xa   : > { %p646_p6 = scmp.ge.s32.totalorder %s849_s20, 1  ;;  %p141_p7 = scmp.eq.s32.totalorder %s138_s26, 0 }
   0xb   : > { %p927_p8 = por %p160_p5, %p159_p3  ;;  %p207_p9 = scmp.lt.s32.totalorder %s849_s20, 3 }
   0xc   : > { %s933_s28 = scalar_select %p141_p7, %s837_s17, %s143_s24  }
   0xd   : > { %p208_p10 = pnand %p646_p6, %p207_p9 }
   0xe   : > { %p244_p11 = scmp.lt.s32.totalorder (!%p208_p10), %s841_s18, 1  ;;  %s241_s30 = sand.u32 (!%p208_p10), 1, %s833_s16  }
   0xf   : > { %211 = sbr.rel (%p208_p10) target bundleno = 263 (0x107), region = 36  ;;  %s662_s6 = sshll.u32 (!%p208_p10), %s841_s18, 7 }
  0x10   : > { %s532_s12 = scalar_lea.sflag (!%p208_p10), [#allocation4], %s241_s30 }
  0x14   : > { %v653_v0 = vld [vmem:[%s1042_s1 + $0x38] sm:$0xff]  ;;  %v851_v2 = vmov 0.0   ;;  %v652_v3 = vld [vmem:[%s1042_s1 + $0x30] sm:$0xff]  ;;  %s245_s11 = scalar_select %p244_p11, %s841_s18, 1  ;;  %v651_v5 = vld [vmem:[%s1042_s1 + $0x28] sm:$0xff]  ;;  %vm278_vm0 = vcmask 261120  }
  0x15   : > { %v271_v1 = vld [vmem:[%s1042_s1 + $0x18] sm:$0xff]  ;;  %681 = vmatprep.subr.mxu0 %v851_v2  ;;  %692 = vmatprep.subr.mxu1 %v851_v2  ;;  %v270_v4 = vld [vmem:[%s1042_s1 + $0x10] sm:$0xff]  ;;  %v269_v6 = vld [vmem:[%s1042_s1 + $0x8] sm:$0xff]  ;;  %vm852_vm1 = vmmov 0   ;;  %v853_v15 = vmov 0   ;;  %vm265_vm2 = vcmask 130048  }
  0x16   : > { %682 = vmatpush3.msra.mxu0 %v653_v0  ;;  %693 = vmatpush3.msra.mxu1 %v271_v1  ;;  %s665_s22 = sshll.u32 %s245_s11, 4  ;;  %v650_v7 = vld [vmem:[%s1042_s1 + $0x20] sm:$0xff]  ;;  %v659_v11 = vld [vmem:[%s1042_s1 + $0x58] sm:$0xff]  ;;  %v658_v12 = vld [vmem:[%s1042_s1 + $0x50] sm:$0xff]  ;;  %266 = vst.msk [vmem:[#allocation2] sm:$0xff] %vm265_vm2, %v851_v2  ;;  %s1000_s11 = scalar_lea.hbm %s1045_s4, %s662_s6 }
  0x17   : > { %683 = vmatprep.subr.mxu0 %v851_v2  ;;  %694 = vmatprep.subr.mxu1 %v851_v2  ;;  %s961_s5 = scalar_lea.vmem %s1041_s0, %s665_s22  ;;  %v268_v9 = vld [vmem:[%s1042_s1] sm:$0xff]  ;;  %v657_v14 = vld [vmem:[%s1042_s1 + $0x48] sm:$0xff]  ;;  %s854_s18 = smov [#allocation3]  }
  0x18   : > { %684 = vmatpush3.msra.mxu0 %v652_v3  ;;  %695 = vmatpush3.msra.mxu1 %v270_v4  ;;  %v272_v8 = vld [vmem:[%s961_s5 + $0x1] sm:$0xff]  ;;  %s777_s14 = sshll.u32 %s854_s18, 4  ;;  %s778_s14 = int_to_ptr.vmem [resolvable:$false] %s777_s14 }
  0x19   : > { %685 = vmatprep.subr.mxu0 %v851_v2  ;;  %696 = vmatprep.subr.mxu1 %v851_v2  ;;  %v267_v10 = vld [vmem:[%s961_s5] sm:$0xff]  ;;  %s779_s21 = scalar_lea.vmem %s778_s14, 256 }
  0x1a   : > { %686 = vmatpush3.msra.mxu0 %v651_v5  ;;  %697 = vmatpush3.msra.mxu1 %v269_v6  ;;  %v513_v13 = vld [vmem:[%s1043_s2] sm:$0xff] }
  0x1b   : > { %687 = vmatprep.subr.mxu0 %v851_v2  ;;  %689 = vmatprep.mubr.msk.f32.mxu0 %vm852_vm1, %v851_v2  ;;  %v656_v16 = vld [vmem:[%s1042_s1 + $0x40] sm:$0xff] }
  0x1c   : > { %688 = vmatpush3.msra.mxu0 %v650_v7  ;;  %698 = vmatprep.subr.mxu1 %v851_v2  ;;  %v425_v17 = vld [vmem:[%s961_s5 + $0x2] sm:$0xff]  ;;  %s647_s5 = sshll.u32 %s241_s30, 3 }
  0x1d   : > { %690 = vmatmul.mubr.msk.f32.vlgmr.msra.gmra.mxu0 %vm278_vm0, %v272_v8  ;;  %699 = vmatpush3.msra.mxu1 %v268_v9  ;;  %v520_v18 = vld [vmem:[%s1044_s3] sm:$0xff]  ;;  %s243_s7 = scalar_lea.vmem [#allocation3], %s647_s5 }
  0x1e   : > { %700 = vmatprep.mubr.msk.f32.mxu1 %vm852_vm1, %v851_v2  ;;  %703 = vmatprep.subr.mxu0 %v851_v2  ;;  %v505_v25 = vld [vmem:[#allocation2] sm:$0xff]  ;;  %s546_s8 = sshll.u32 %s243_s7, 4  ;;  %s547_s8 = int_to_ptr.vmem [resolvable:$true] %s546_s8 }
  0x1f   : > { %701 = vmatmul.mubr.msk.f32.vlgmr.msra.gmra.mxu1 %vm278_vm0, %v267_v10  ;;  %704 = vmatpush3.msra.mxu0 %v659_v11  ;;  %s773_s13 = scalar_lea.vmem %s547_s8, 128  ;;  %p780_p1 = scmp.lt.s32.totalorder %s547_s8, %s778_s14 }
  0x20   : > { %705 = vmatprep.subr.mxu0 %v851_v2  ;;  %711 = vmatprep.mubr.msk.f32.mxu0 %vm852_vm1, %v851_v2  ;;  %p774_p12 = scmp.ne.s32.totalorder %s547_s8, %s773_s13  ;;  %p781_p2 = scmp.lt.s32.totalorder %s779_s21, %s773_s13 }
  0x21   : > { %706 = vmatpush3.msra.mxu0 %v658_v12  ;;  %772 = vset.pattern.permute.xlu0 %v853_v15 }
  0x22   : > { %707 = vmatprep.subr.mxu0 %v851_v2  ;;  %516 = vperm.xlu0 %772, %v513_v13   ;;  %p775_p13 = pnand %p774_p12, %p920_p4  ;;  %p782_p3 = por %p781_p2, %p780_p1 }
  0x23   : > { %708 = vmatpush3.msra.mxu0 %v657_v14 }
  0x24   : > { %709 = vmatprep.subr.mxu0 %v851_v2  ;;  %p776_p0 = pneg %p775_p13 }
  0x25   : > { %710 = vmatpush3.msra.mxu0 %v656_v16 }
  0x26   : > { %712 = vmatmul.mubr.msk.f32.vlgmr.msra.gmra.mxu0 %vm278_vm0, %v425_v17  ;;  %523 = vperm.xlu0 %772, %v520_v18   ;;  %p783_p5 = pnand %p782_p3, %p776_p0 }
  0x9d   : > { %v517_v29 = vpop.permute.xlu0 %516 }
  0xa1   : > { %v524_v32 = vpop.permute.xlu0 %523 }
  0xdd   : > { %v348_v19 = vpop.f32.mrf.mxu0 }
  0xdf   : > { %v421_v20 = vpop.f32.mrf.mxu1  ;;  %v691_v21 = vpop.f32.mrf.mxu0 }
  0xe0   : > { %v422_v23 = vadd.f32 %v421_v20, %v348_v19 }
  0xe1   : > { %v702_v22 = vpop.f32.mrf.mxu1 }
  0xe6   : > { %v500_v24 = vpop.f32.mrf.mxu0 }
  0xe7   : > { %v504_v26 = vadd.f32 %v500_v24, %v422_v23 }
  0xe8   : > { %v713_v27 = vpop.f32.mrf.mxu0 }
  0xe9   : > { %v506_v28 = vadd.f32 %v505_v25, %v504_v26 }
  0xeb   : > { %508 = vst.msk [vmem:[#allocation2] sm:$0xff] %vm265_vm2, %v506_v28 }
  0xf2   : > { %v512_v30 = vld [vmem:[#allocation2] sm:$0xff] }
  0xf3   : > { %v519_v31 = vmul.f32 %v517_v29, %v512_v30 }
  0xf5   : > { %v526_v33 = vadd.f32 %v524_v32, %v519_v31 }
  0xf7   : > { %vm527_vm3 = vcmp.ge.f32.partialorder %v526_v33, 0.0  ;;  %v528_v34 = vmul.f32 0.2, %v526_v33 }
  0xf9   : > { %v529_v35 = vsel %vm527_vm3, %v526_v33, %v528_v34 }
  0xfa   : > { %530 = vst.msk [vmem:[%s243_s7] sm:$0xff] %vm265_vm2, %v529_v35 }
  0xfb   : > { %786 = shalt.err (!%p783_p5)
}
  0xfc   : > { %s787_s22 = scalar_lea.hbm %s1000_s11, 128  ;;  %s791_s29 = scalar_lea.hbm %s1045_s4, 256 }
  0xfd   : > { %p788_p6 = scmp.ne.s32.totalorder %s1000_s11, %s787_s22  ;;  %p792_p10 = scmp.lt.s32.totalorder %s1000_s11, %s1045_s4 }
  0xfe   : > { %p793_p11 = scmp.lt.s32.totalorder %s791_s29, %s787_s22 }
  0xff   : > { %p789_p7 = pnand %p788_p6, %p920_p4 }
 0x100   : > { %p794_p12 = por %p793_p11, %p792_p10 }
 0x101   : > { %p790_p9 = pneg %p789_p7 }
 0x103   : > { %p795_p13 = pnand %p794_p12, %p790_p9 }
 0x105   : > { %798 = shalt.err (!%p795_p13)
}
 0x106   : > { %714 = dma.vmem_to_hbm [thread:$0]  (%p920_p4), %s547_s8, 128, %s1000_s11, %s532_s12  }
 0x107 PF: > { %p720_p0 = scmp.ge.s32.totalorder %s849_s20, 2  ;;  %s558_s6 = sand.u32 1, %s829_s15  }
 0x108   : > { %s559_s7 = scalar_lea.sflag [#allocation4], %s558_s6 }
 0x109   : > { %p717_p1 = pnand %p720_p0, %p927_p8 }
 0x10b   : > { %p718_p2 = pneg %p717_p1 }
 0x10d   : > { %824 = dma.done.wait (%p718_p2), %s559_s7, 128  }
 0x10e   : > { %826 = vsyncadd (%p718_p2), %s559_s7, 4294967168  ;;  %s17_s20 = sadd.s32 1, %s849_s20   ;;  %s1048_s15 = smov %s833_s16 }
 0x10f   : > { %p14_p3 = scmp.ge.s32.totalorder %s17_s20, 4   ;;  %s1049_s16 = smov %s837_s17 }
 0x110   : > { %s1050_s17 = smov %s933_s28  ;;  %s1051_s18 = smov %s845_s19 }
 0x111   : > { %s1052_s19 = smov %s1054_s23  ;;  %16 = sbr.rel (!%p14_p3) target bundleno = 4 (0x4), region = 84 }
 0x116   :  { %564 = vsyncpa [#allocation4], 1 }
 0x117   :  { %566 = vsyncpa [#allocation4 + $0x1], 1 }

</bundles_post_ra>
